<compile_context>
chip_gen: v6e
topology: v6e:2x2x1
jax: 0.10.0
libtpu: 0.0.40
codegen_flags: <defaults>
</compile_context>

<pallas_src>
import jax
import jax.numpy as jnp
import numpy as np
from jax.experimental import pallas as pl
from jax.experimental.pallas import tpu as pltpu


# ---------------------------------------------------------------------------
# Kernel bodies
# ---------------------------------------------------------------------------

def _div_body(x_ref, y_ref, yh_ref, o_ref, combine):
    """Shared body.

    combine(xc, xp, yc, yp) -> wx1*xc + wx0*xp + wy1*yc + wy0*yp
    (the specialized path inlines [-1, 1] as (xc - xp) + (yc - yp)).
    """
    # v5e has no bf16 VPU; compute sub-32-bit inputs in f32 (also matches the
    # torch conv which uses f32 weights).
    cdtype = jnp.float32 if jnp.dtype(x_ref.dtype).itemsize < 4 else x_ref.dtype
    x = x_ref[...].astype(cdtype)                       # (TB, TH, W)
    y = y_ref[...].astype(cdtype)

    # Halo row: y[b, tile_start-1, :] (clamped to row 0 at the global top, which
    # reproduces ReplicationPad2d).  The halo block is a sublane-aligned slab;
    # we need its last row for interior tiles and its first row for the top tile.
    nh = yh_ref.shape[1]
    top_row = yh_ref[:, 0:1, :].astype(cdtype)          # (TB, 1, W)
    last_row = yh_ref[:, nh - 1:nh, :].astype(cdtype)
    prev_row = jnp.where(pl.program_id(1) == 0, top_row, last_row)

    # Shifts on the XLU (otherwise idle here).  They wrap at lane-0 / sublane-0;
    # those positions are fixed by narrow stores below (no full-tile iota/where).
    roll_x = pltpu.roll(x, shift=1, axis=2)             # x[..., w-1]
    roll_y = pltpu.roll(y, shift=1, axis=1)             # y[..., h-1, :]

    odt = o_ref.dtype
    # Bulk store (w==0 column and h==0 row fixed by the narrow stores below).
    o_ref[...] = combine(x, roll_x, y, roll_y).astype(odt)
    # h == 0 row of this tile: y_prev is the halo row.
    o_ref[:, 0:1, :] = combine(x[:, 0:1, :], roll_x[:, 0:1, :],
                               y[:, 0:1, :], prev_row).astype(odt)
    # w == 0 column: x_prev is x itself (left ReplicationPad2d).
    o_ref[:, :, 0:1] = combine(x[:, :, 0:1], x[:, :, 0:1],
                               y[:, :, 0:1], roll_y[:, :, 0:1]).astype(odt)
    # Corner (h == 0, w == 0): both boundary conditions.
    o_ref[:, 0:1, 0:1] = combine(x[:, 0:1, 0:1], x[:, 0:1, 0:1],
                                 y[:, 0:1, 0:1], prev_row[:, :, 0:1]).astype(odt)


def _divergence_kernel(x_ref, y_ref, yh_ref, o_ref):
    """Specialized kernel for the module's fixed [-1, 1] conv weights."""
    _div_body(x_ref, y_ref, yh_ref, o_ref,
              lambda xc, xp, yc, yp: (xc - xp) + (yc - yp))


def _divergence_kernel_general(w_ref, x_ref, y_ref, yh_ref, o_ref):
    """General path: conv weights [wx0, wx1, wy0, wy1] live in SMEM."""
    wx0, wx1, wy0, wy1 = w_ref[0], w_ref[1], w_ref[2], w_ref[3]
    _div_body(x_ref, y_ref, yh_ref, o_ref,
              lambda xc, xp, yc, yp: wx1 * xc + wx0 * xp + wy1 * yc + wy0 * yp)


# ---------------------------------------------------------------------------
# Chip / tiling helpers
# ---------------------------------------------------------------------------

_TARGET_TILE = 2 << 20       # ~2 MiB per-array tiles already hit ~85% of roofline
_MAX_TILE = 4 << 20
_MIN_TILE = 512 << 10


def _chip_info():
    """(physical VMEM bytes, target minimum grid steps) for the local chip."""
    kind = ""
    try:
        kind = jax.devices()[0].device_kind.lower()
    except Exception:
        pass
    is_v7 = "7" in kind                      # v7x: 2 TCs, 64 MiB VMEM per TC
    vmem_cap = None
    try:
        vmem_cap = int(pltpu.get_tpu_info().vmem_capacity_bytes)
    except Exception:
        vmem_cap = None
    if not vmem_cap or vmem_cap <= 0:
        vmem_cap = (64 << 20) if is_v7 else (128 << 20)   # v5e/v6e have 128 MiB
    min_steps = 8 if is_v7 else 4            # 2-4 steps per TensorCore
    return vmem_cap, min_steps


def _choose_tiles(B, H, W, itemsize, min_steps):
    """Pick (batch tile, H tile, halo rows)."""
    sub = {4: 8, 2: 16, 1: 32}.get(itemsize, 8)     # sublane multiple for dtype
    row_bytes = W * itemsize
    img_bytes = H * row_bytes

    # ---- batch tile --------------------------------------------------------
    if img_bytes <= _TARGET_TILE:
        divisors = [d for d in range(1, B + 1) if B % d == 0]
        fitting = [d for d in divisors if d * img_bytes <= _TARGET_TILE]
        good = [d for d in fitting
                if B // d >= min_steps and d * img_bytes >= _MIN_TILE]
        tb = (good or fitting or [1])[-1]
    else:
        tb = 1

    # ---- H tile (large single images, or to expose more grid steps) ---------
    th = H
    tile_bytes = tb * H * row_bytes
    need_steps = (B // tb) < min_steps
    if (tile_bytes > _MAX_TILE or need_steps) and H % sub == 0 and H > sub:
        cands = [t for t in range(sub, H + 1, sub) if H % t == 0]
        steps = lambda t: (B // tb) * (H // t)
        fit_t = [t for t in cands if tb * t * row_bytes <= _TARGET_TILE]
        good_t = [t for t in fit_t
                  if steps(t) >= min_steps and tb * t * row_bytes >= _MIN_TILE]
        if good_t:
            th = good_t[-1]
        elif tile_bytes > _MAX_TILE:
            fit_m = [t for t in cands if tb * t * row_bytes <= _MAX_TILE]
            th = (fit_m or [cands[0]])[-1]
        # else: tile already small; not worth sub-_MIN_TILE tiles.
    # TODO(synk): huge images with ragged H (not a multiple of the sublane count)
    # fall back to a full-H tile; pad H in the wrapper if that ever matters.

    halo = min(sub, H)
    return tb, th, halo


def _is_default_weight(w):
    """True iff `w` is statically known to equal the module's fixed [-1, 1] kernel.

    Pass None (the module default) to always take the specialized path, even
    under jit.  Concrete numpy / JAX arrays are checked once at trace time;
    traced weights fall back to the general SMEM-weight path.
    """
    if w is None:
        return True
    try:
        arr = np.asarray(w, dtype=np.float64).reshape(-1)
    except Exception:        # traced under jit: cannot specialize
        return False
    return arr.size == 2 and np.allclose(arr, [-1.0, 1.0])


# ---------------------------------------------------------------------------
# Public wrapper
# ---------------------------------------------------------------------------

def divergence(tensor_x, tensor_y, conv_x_weight=None, conv_y_weight=None,
               *, tile_batch=None, tile_h=None):
    """tensor_x, tensor_y: (N, 1, H, W). conv weights: (1,1,1,2) / (1,1,2,1) or None."""
    assert tensor_x.ndim == 4 and tensor_y.ndim == 4
    N, C, H, W = tensor_x.shape
    assert C == 1, "Divergence conv has in_channels=1"
    assert tensor_y.shape == tensor_x.shape

    B = N * C
    x = tensor_x.reshape(B, H, W)
    y = tensor_y.reshape(B, H, W)
    itemsize = jnp.dtype(tensor_x.dtype).itemsize

    vmem_cap, min_steps = _chip_info()
    tb, th, halo = _choose_tiles(B, H, W, itemsize, min_steps)
    if tile_batch is not None:                 # test / tuning override
        assert B % tile_batch == 0
        tb = int(tile_batch)
    if tile_h is not None:
        assert H % tile_h == 0
        th = int(tile_h)
        assert th == H or th % halo == 0
    grid = (B // tb, H // th)

    tile_spec = pl.BlockSpec((tb, th, W), lambda b, h: (b, h, 0))
    hstride = th // halo
    # Halo block: a sublane-aligned slab whose LAST row is y[b, h*th - 1, :];
    # clamped to block 0 at the top (its FIRST row is then y[b, 0, :], i.e. the
    # replication-pad value).  The kernel picks the right row per tile.
    halo_spec = pl.BlockSpec(
        (tb, halo, W), lambda b, h: (b, jnp.maximum(h * hstride - 1, 0), 0))

    # VMEM accounting: 3 pipelined arrays double-buffered + halo, plus ~6
    # tile-sized f32 kernel temporaries (x, y, roll_x, roll_y, sums).
    tile_bytes = tb * th * W * itemsize
    halo_bytes = tb * halo * W * itemsize
    tmp_bytes = tb * th * W * 4
    vmem_needed = 6 * tile_bytes + 2 * halo_bytes + 6 * tmp_bytes + (4 << 20)
    vmem_limit = int(min(max(vmem_needed, 32 << 20),
                         vmem_cap - (8 << 20), 100 << 20))

    compiler_params = pltpu.CompilerParams(
        dimension_semantics=("parallel", "parallel"),
        vmem_limit_bytes=vmem_limit)
    out_shape = jax.ShapeDtypeStruct((B, H, W), tensor_x.dtype)
    # TODO(synk): if W is small or far from a multiple of 128, fold rows into
    # the lane dim (or pad W once in the wrapper) to keep output stores
    # lane-dense; left as-is since W here is either tiny-test or >=128.

    if _is_default_weight(conv_x_weight) and _is_default_weight(conv_y_weight):
        out = pl.pallas_call(
            _divergence_kernel,
            out_shape=out_shape,
            grid=grid,
            in_specs=[tile_spec, tile_spec, halo_spec],
            out_specs=tile_spec,
            compiler_params=compiler_params,
        )(x, y, y)
    else:
        w = jnp.concatenate([
            jnp.asarray(conv_x_weight, jnp.float32).reshape(2),
            jnp.asarray(conv_y_weight, jnp.float32).reshape(2)])
        out = pl.pallas_call(
            _divergence_kernel_general,
            out_shape=out_shape,
            grid=grid,
            in_specs=[pl.BlockSpec(memory_space=pltpu.MemorySpace.SMEM),
                      tile_spec, tile_spec, halo_spec],
            out_specs=tile_spec,
            compiler_params=compiler_params,
        )(w, x, y, y)

    return out.reshape(N, C, H, W)


# ---------------------------------------------------------------------------
# Pure-JAX reference & self-test
# ---------------------------------------------------------------------------

def _divergence_ref(tensor_x, tensor_y, wx, wy):
    x = tensor_x[:, 0].astype(jnp.float32)
    y = tensor_y[:, 0].astype(jnp.float32)
    x_prev = jnp.concatenate([x[:, :, :1], x[:, :, :-1]], axis=2)
    y_prev = jnp.concatenate([y[:, :1, :], y[:, :-1, :]], axis=1)
    wx = jnp.asarray(wx, jnp.float32).reshape(2)
    wy = jnp.asarray(wy, jnp.float32).reshape(2)
    out = wx[0] * x_prev + wx[1] * x + wy[0] * y_prev + wy[1] * y
    return out[:, None].astype(tensor_x.dtype)


if __name__ == "__main__":
    key = jax.random.PRNGKey(0)
    kx, ky, k2x, k2y, k3x, k3y = jax.random.split(key, 6)

    # Module __init__ weights (fixed, trainable=False by default).
    conv_x_weight = jnp.array([-1.0, 1.0], jnp.float32).reshape(1, 1, 1, 2)
    conv_y_weight = jnp.array([-1.0, 1.0], jnp.float32).reshape(1, 1, 2, 1)

    # --- 1) small test, default (None) weights -> specialized path ----------
    N, C, H, W = 2, 1, 16, 16
    tx = jax.random.normal(kx, (N, C, H, W), dtype=jnp.float32)
    ty = jax.random.normal(ky, (N, C, H, W), dtype=jnp.float32)
    out = jax.block_until_ready(divergence(tx, ty))
    ref = _divergence_ref(tx, ty, conv_x_weight, conv_y_weight)
    assert out.shape == (N, C, H, W)
    assert jnp.allclose(out, ref, atol=1e-5, rtol=1e-5)

    # --- 2) lane-dense, batch-tiled; explicit default weights ---------------
    tx2 = jax.random.normal(k2x, (8, 1, 32, 128), dtype=jnp.float32)
    ty2 = jax.random.normal(k2y, (8, 1, 32, 128), dtype=jnp.float32)
    out2 = jax.block_until_ready(divergence(tx2, ty2, conv_x_weight, conv_y_weight))
    ref2 = _divergence_ref(tx2, ty2, conv_x_weight, conv_y_weight)
    assert jnp.allclose(out2, ref2, atol=1e-5, rtol=1e-5)

    # --- 3) H-tiled halo path (forced small tiles so num_h > 1) -------------
    tx3 = jax.random.normal(k3x, (2, 1, 64, 128), dtype=jnp.float32)
    ty3 = jax.random.normal(k3y, (2, 1, 64, 128), dtype=jnp.float32)
    out3 = jax.block_until_ready(divergence(tx3, ty3, tile_batch=1, tile_h=16))
    ref3 = _divergence_ref(tx3, ty3, conv_x_weight, conv_y_weight)
    assert jnp.allclose(out3, ref3, atol=1e-5, rtol=1e-5)

    # --- 4) general (SMEM-weight) path, also H-tiled -------------------------
    wxg = jnp.array([-0.5, 2.0], jnp.float32).reshape(1, 1, 1, 2)
    wyg = jnp.array([0.25, 1.5], jnp.float32).reshape(1, 1, 2, 1)
    out4 = jax.block_until_ready(
        divergence(tx3, ty3, wxg, wyg, tile_batch=1, tile_h=16))
    ref4 = _divergence_ref(tx3, ty3, wxg, wyg)
    assert jnp.allclose(out4, ref4, atol=1e-5, rtol=1e-5)

    # --- 5) bf16 inputs (kernel upcasts to f32 internally) -------------------
    tx5 = tx2.astype(jnp.bfloat16)
    ty5 = ty2.astype(jnp.bfloat16)
    out5 = jax.block_until_ready(divergence(tx5, ty5))
    ref5 = _divergence_ref(tx5, ty5, conv_x_weight, conv_y_weight)
    assert jnp.allclose(out5.astype(jnp.float32), ref5.astype(jnp.float32),
                        atol=3e-2, rtol=3e-2)

    print("KERNEL_OK")
</pallas_src>

<mosaic_0001>
module attributes {stable_mosaic.version = 11 : i64} {
  func.func @_divergence_kernel(%arg0: i32, %arg1: i32, %arg2: memref<2x16x16xf32, #tpu.memory_space<vmem>>, %arg3: memref<2x16x16xf32, #tpu.memory_space<vmem>>, %arg4: memref<2x8x16xf32, #tpu.memory_space<vmem>>, %arg5: memref<2x16x16xf32, #tpu.memory_space<vmem>>) attributes {dimension_semantics = [#tpu.dimension_semantics<parallel>, #tpu.dimension_semantics<parallel>], iteration_bounds = array<i64: 1, 1>, scalar_prefetch = 0 : i64, scratch_operands = 0 : i64, tpu.core_type = #tpu.core_type<tc>, window_params = [{transform_indices = @transform_0, window_bounds = array<i64: 2, 16, 16>}, {transform_indices = @transform_1, window_bounds = array<i64: 2, 16, 16>}, {transform_indices = @transform_2, window_bounds = array<i64: 2, 8, 16>}, {transform_indices = @transform_3, window_bounds = array<i64: 2, 16, 16>}]} {
    %c0 = arith.constant 0 : index
    %c0_0 = arith.constant 0 : index
    %c0_1 = arith.constant 0 : index
    %0 = vector.load %arg2[%c0, %c0_0, %c0_1] : memref<2x16x16xf32, #tpu.memory_space<vmem>>, vector<2x16x16xf32>
    %c0_2 = arith.constant 0 : index
    %c0_3 = arith.constant 0 : index
    %c0_4 = arith.constant 0 : index
    %1 = vector.load %arg3[%c0_2, %c0_3, %c0_4] : memref<2x16x16xf32, #tpu.memory_space<vmem>>, vector<2x16x16xf32>
    %c0_5 = arith.constant 0 : index
    %c0_6 = arith.constant 0 : index
    %c0_7 = arith.constant 0 : index
    %2 = vector.load %arg4[%c0_5, %c0_6, %c0_7] : memref<2x8x16xf32, #tpu.memory_space<vmem>>, vector<2x1x16xf32>
    %c0_8 = arith.constant 0 : index
    %c7 = arith.constant 7 : index
    %c0_9 = arith.constant 0 : index
    %3 = vector.load %arg4[%c0_8, %c7, %c0_9] : memref<2x8x16xf32, #tpu.memory_space<vmem>>, vector<2x1x16xf32>
    %c0_i32 = arith.constant 0 : i32
    %4 = arith.cmpi eq, %arg1, %c0_i32 : i32
    %5 = arith.select %4, %2, %3 : vector<2x1x16xf32>
    %c1_i32 = arith.constant 1 : i32
    %6 = tpu.dynamic_rotate %0 by %c1_i32 dim 2 : vector<2x16x16xf32>, i32 -> vector<2x16x16xf32>
    %c1_i32_10 = arith.constant 1 : i32
    %7 = tpu.dynamic_rotate %1 by %c1_i32_10 dim 1 : vector<2x16x16xf32>, i32 -> vector<2x16x16xf32>
    %8 = arith.subf %0, %6 : vector<2x16x16xf32>
    %9 = arith.subf %1, %7 : vector<2x16x16xf32>
    %10 = arith.addf %8, %9 : vector<2x16x16xf32>
    %c0_11 = arith.constant 0 : index
    %c0_12 = arith.constant 0 : index
    %c0_13 = arith.constant 0 : index
    %11 = vector.load %arg5[%c0_11, %c0_12, %c0_13] : memref<2x16x16xf32, #tpu.memory_space<vmem>>, vector<2x16x16xf32>
    tpu.vector_store %arg5[%c0_11, %c0_12, %c0_13], %10 {strides = array<i32>} : memref<2x16x16xf32, #tpu.memory_space<vmem>>, vector<2x16x16xf32>,
    %12 = vector.extract_strided_slice %0 {offsets = [0, 0, 0], sizes = [2, 1, 16], strides = [1, 1, 1]} : vector<2x16x16xf32> to vector<2x1x16xf32>
    %13 = vector.extract_strided_slice %6 {offsets = [0, 0, 0], sizes = [2, 1, 16], strides = [1, 1, 1]} : vector<2x16x16xf32> to vector<2x1x16xf32>
    %14 = vector.extract_strided_slice %1 {offsets = [0, 0, 0], sizes = [2, 1, 16], strides = [1, 1, 1]} : vector<2x16x16xf32> to vector<2x1x16xf32>
    %15 = arith.subf %12, %13 : vector<2x1x16xf32>
    %16 = arith.subf %14, %5 : vector<2x1x16xf32>
    %17 = arith.addf %15, %16 : vector<2x1x16xf32>
    %c0_14 = arith.constant 0 : index
    %c0_15 = arith.constant 0 : index
    %c0_16 = arith.constant 0 : index
    %18 = vector.load %arg5[%c0_14, %c0_15, %c0_16] : memref<2x16x16xf32, #tpu.memory_space<vmem>>, vector<2x1x16xf32>
    tpu.vector_store %arg5[%c0_14, %c0_15, %c0_16], %17 {strides = array<i32>} : memref<2x16x16xf32, #tpu.memory_space<vmem>>, vector<2x1x16xf32>,
    %19 = vector.extract_strided_slice %0 {offsets = [0, 0, 0], sizes = [2, 16, 1], strides = [1, 1, 1]} : vector<2x16x16xf32> to vector<2x16x1xf32>
    %20 = vector.extract_strided_slice %0 {offsets = [0, 0, 0], sizes = [2, 16, 1], strides = [1, 1, 1]} : vector<2x16x16xf32> to vector<2x16x1xf32>
    %21 = vector.extract_strided_slice %1 {offsets = [0, 0, 0], sizes = [2, 16, 1], strides = [1, 1, 1]} : vector<2x16x16xf32> to vector<2x16x1xf32>
    %22 = vector.extract_strided_slice %7 {offsets = [0, 0, 0], sizes = [2, 16, 1], strides = [1, 1, 1]} : vector<2x16x16xf32> to vector<2x16x1xf32>
    %23 = arith.subf %19, %20 : vector<2x16x1xf32>
    %24 = arith.subf %21, %22 : vector<2x16x1xf32>
    %25 = arith.addf %23, %24 : vector<2x16x1xf32>
    %c0_17 = arith.constant 0 : index
    %c0_18 = arith.constant 0 : index
    %c0_19 = arith.constant 0 : index
    %26 = vector.load %arg5[%c0_17, %c0_18, %c0_19] : memref<2x16x16xf32, #tpu.memory_space<vmem>>, vector<2x16x1xf32>
    tpu.vector_store %arg5[%c0_17, %c0_18, %c0_19], %25 {strides = array<i32>} : memref<2x16x16xf32, #tpu.memory_space<vmem>>, vector<2x16x1xf32>,
    %27 = vector.extract_strided_slice %0 {offsets = [0, 0, 0], sizes = [2, 1, 1], strides = [1, 1, 1]} : vector<2x16x16xf32> to vector<2x1x1xf32>
    %28 = vector.extract_strided_slice %0 {offsets = [0, 0, 0], sizes = [2, 1, 1], strides = [1, 1, 1]} : vector<2x16x16xf32> to vector<2x1x1xf32>
    %29 = vector.extract_strided_slice %1 {offsets = [0, 0, 0], sizes = [2, 1, 1], strides = [1, 1, 1]} : vector<2x16x16xf32> to vector<2x1x1xf32>
    %30 = vector.extract_strided_slice %5 {offsets = [0, 0, 0], sizes = [2, 1, 1], strides = [1, 1, 1]} : vector<2x1x16xf32> to vector<2x1x1xf32>
    %31 = arith.subf %27, %28 : vector<2x1x1xf32>
    %32 = arith.subf %29, %30 : vector<2x1x1xf32>
    %33 = arith.addf %31, %32 : vector<2x1x1xf32>
    %c0_20 = arith.constant 0 : index
    %c0_21 = arith.constant 0 : index
    %c0_22 = arith.constant 0 : index
    %34 = vector.load %arg5[%c0_20, %c0_21, %c0_22] : memref<2x16x16xf32, #tpu.memory_space<vmem>>, vector<2x1x1xf32>
    tpu.vector_store %arg5[%c0_20, %c0_21, %c0_22], %33 {strides = array<i32>} : memref<2x16x16xf32, #tpu.memory_space<vmem>>, vector<2x1x1xf32>,
    return
  }
  func.func @transform_0(%arg0: i32, %arg1: i32) -> (i32, i32, i32) {
    %c0_i32 = arith.constant 0 : i32
    %c0_i32_0 = arith.constant 0 : i32
    return %arg0, %arg1, %c0_i32 : i32, i32, i32
  }
  func.func @transform_1(%arg0: i32, %arg1: i32) -> (i32, i32, i32) {
    %c0_i32 = arith.constant 0 : i32
    %c0_i32_0 = arith.constant 0 : i32
    return %arg0, %arg1, %c0_i32 : i32, i32, i32
  }
  func.func @transform_2(%arg0: i32, %arg1: i32) -> (i32, i32, i32) {
    %c2_i32 = arith.constant 2 : i32
    %0 = arith.muli %arg1, %c2_i32 : i32
    %c1_i32 = arith.constant 1 : i32
    %1 = arith.subi %0, %c1_i32 : i32
    %c0_i32 = arith.constant 0 : i32
    %2 = arith.maxsi %1, %c0_i32 : i32
    %c0_i32_0 = arith.constant 0 : i32
    %c0_i32_1 = arith.constant 0 : i32
    return %arg0, %2, %c0_i32_0 : i32, i32, i32
  }
  func.func @transform_3(%arg0: i32, %arg1: i32) -> (i32, i32, i32) {
    %c0_i32 = arith.constant 0 : i32
    %c0_i32_0 = arith.constant 0 : i32
    return %arg0, %arg1, %c0_i32 : i32, i32, i32
  }
}

</mosaic_0001>

<bundles_post_ra>
// kernel: tpu_custom_call.1
= control target key start
LH: loop header
LB: loop body
LE: loop exit
PB: predicated region body
PF: predicated region fallthrough
CT: control target
= control target key end

     0   :  { %8 = vsyncpa [#allocation3], 0  ;;  %s393_s0 = inlined_call_operand.hbm [shape: f32[2,16,16], index: 0, kind: input, shape index: {}]   ;;  %s394_s1 = inlined_call_operand.hbm [shape: f32[2,16,16], index: 1, kind: input, shape index: {}]   ;;  %s395_s2 = inlined_call_operand.hbm [shape: f32[2,16,16], index: 2, kind: input, shape index: {}]   ;;  %s396_s3 = inlined_call_operand.hbm [shape: f32[2,16,16], index: 3, kind: output, shape index: {}]  }
   0x1   :  { %9 = vsyncpa [#allocation6], 0 }
   0x2   :  { %10 = vsyncpa [#allocation4], 0  ;;  %s293_s12 = smov [#allocation5]   ;;  %s294_s14 = smov [#allocation2]  }
   0x3   :  { %s28_s13 = sshll.u32 %s293_s12, 4  ;;  %s16_s15 = sshll.u32 %s294_s14, 4  ;;  %s29_s13 = int_to_ptr.vmem [resolvable:$true] %s28_s13  ;;  %s17_s15 = int_to_ptr.vmem [resolvable:$true] %s16_s15 }
   0x4   :  { %s215_s16 = scalar_lea.vmem %s29_s13, 512  ;;  %p220_p1 = scmp.lt.s32.totalorder %s29_s13, %s29_s13 }
   0x5   :  { %p216_p0 = scmp.ne.s32.totalorder %s29_s13, %s215_s16  ;;  %p221_p2 = scmp.lt.s32.totalorder %s215_s16, %s215_s16 }
   0x7   :  { %p222_p3 = por %p221_p2, %p220_p1 }
   0x9   :  { %p223_p4 = pnand %p222_p3, %p216_p0 }
   0xb   :  { %226 = shalt.err (!%p223_p4)
}
   0xc   :  { %s295_s17 = smov 128   ;;  %s296_s18 = smov 8  }
   0xd   :  { %34 = dma.hbm_to_vmem [thread:$0]  %s394_s1, 512, %s29_s13, [#allocation6], %s295_s17, %s295_s17, %s296_s18  }
   0xe   :  { %s235_s21 = scalar_lea.vmem %s17_s15, 512  ;;  %p240_p6 = scmp.lt.s32.totalorder %s17_s15, %s17_s15 }
   0xf   :  { %p236_p5 = scmp.ne.s32.totalorder %s17_s15, %s235_s21  ;;  %p241_p7 = scmp.lt.s32.totalorder %s235_s21, %s235_s21 }
  0x11   :  { %p242_p8 = por %p241_p7, %p240_p6 }
  0x13   :  { %p243_p9 = pnand %p242_p8, %p236_p5 }
  0x15   :  { %246 = shalt.err (!%p243_p9)
}
  0x16   :  { %22 = dma.hbm_to_vmem [thread:$0]  %s393_s0, 512, %s17_s15, [#allocation3], %s295_s17, %s295_s17, %s296_s18  }
  0x17   :  { %s297_s24 = smov [#allocation7]  }
  0x18   :  { %s46_s25 = sshll.u32 %s297_s24, 4  ;;  %s47_s25 = int_to_ptr.vmem [resolvable:$true] %s46_s25 }
  0x19   :  { %s255_s26 = scalar_lea.vmem %s47_s25, 256  ;;  %p260_p11 = scmp.lt.s32.totalorder %s47_s25, %s47_s25 }
  0x1a   :  { %p256_p10 = scmp.ne.s32.totalorder %s47_s25, %s255_s26  ;;  %p261_p12 = scmp.lt.s32.totalorder %s255_s26, %s255_s26 }
  0x1c   :  { %p262_p13 = por %p261_p12, %p260_p11 }
  0x1e   :  { %p263_p0 = pnand %p262_p13, %p256_p10 }
  0x20   :  { %266 = shalt.err (!%p263_p0)
}
  0x21   :  { %s298_s1 = smov 256  }
  0x22   :  { %52 = dma.hbm_to_vmem [thread:$0]  %s395_s2, 256, %s47_s25, [#allocation6], %s298_s1, %s295_s17, %s296_s18  }
  0x23   :  { %287 = dma.done.wait [#allocation3], 512  }
  0x24   :  { %288 = vsyncadd [#allocation3], 4294966784 }
  0x25   :  { %289 = dma.done.wait [#allocation6], 768  }
  0x26   :  { %290 = vsyncadd [#allocation6], 4294966528  ;;  %v66_v0 = vld [vmem:[#allocation2] sm:$0xff]  ;;  %v339_v1 = vld [vmem:[#allocation2 + $0x8] sm:$0xff]  ;;  %s299_s0 = smov 16   ;;  %vm84_vm0 = vcmask 1047680   ;;  %v113_v20 = vlaneseq }
  0x27   :  { %85 = vrot.lane.b32.xlu0 %v66_v0, %s299_s0  ;;  %88 = vrot.lane.b32.xlu1 %v339_v1, %s299_s0  ;;  %v342_v2 = vld [vmem:[#allocation2 + $0x10] sm:$0xff]  ;;  %v344_v3 = vld [vmem:[#allocation2 + $0x18] sm:$0xff]  ;;  %s300_s2 = smov 113   ;;  %v70_v21 = vld [vmem:[#allocation5] sm:$0xff]  ;;  %v160_v32 = vsub.f32 %v66_v0, %v66_v0  ;;  %vm148_vm2 = vcmask 130048   ;;  %vm157_vm3 = vcmask 122880   ;;  %v161_v44 = vsub.f32 %v339_v1, %v339_v1 }
  0x28   :  { %v71_v22 = vld [vmem:[#allocation5 + $0x8] sm:$0xff]  ;;  %v114_v23 = vshrl.u32 %v113_v20, 7  ;;  %v72_v24 = vld [vmem:[#allocation5 + $0x10] sm:$0xff]  ;;  %v73_v25 = vld [vmem:[#allocation5 + $0x18] sm:$0xff]  ;;  %v109_v26 = vrot.slane %v70_v21, 7  ;;  %v162_v47 = vsub.f32 %v342_v2, %v342_v2  ;;  %vm168_vm4 = vcmask 7168  }
  0x29   :  { %v111_v27 = vrot.slane %v71_v22, 7  ;;  %v110_v28 = vrot.slane %v72_v24, 7  ;;  %v112_v29 = vrot.slane %v73_v25, 7  ;;  %v74_v30 = vld [vmem:[#allocation7] sm:$0x1]  ;;  %vm175_vm5 = vcmask 0  }
  0x2a   :  { %vm115_vm1 = vcmp.lt.s32.totalorder %v114_v23, 1  ;;  %v153_v35 = vsub.f32 %v70_v21, %v74_v30  ;;  %v75_v36 = vld [vmem:[#allocation7 + $0x8] sm:$0x1]  ;;  %v163_v56 = vsub.f32 %v344_v3, %v344_v3  ;;  %s301_s29 = smov [#allocation8]  }
  0x2b   :  { %91 = vrot.lane.b32.xlu0 %v342_v2, %s299_s0  ;;  %94 = vrot.lane.b32.xlu1 %v344_v3, %s299_s0  ;;  %v118_v31 = vsel %vm115_vm1, %v111_v27, %v109_v26  ;;  %v119_v33 = vsel %vm115_vm1, %v112_v29, %v110_v28  ;;  %v116_v37 = vsel %vm115_vm1, %v109_v26, %v111_v27  ;;  %s183_s30 = sshll.u32 %s301_s29, 4  ;;  %s184_s30 = int_to_ptr.vmem [resolvable:$true] %s183_s30 }
  0x2c   :  { %v140_v34 = vsub.f32 %v70_v21, %v118_v31  ;;  %v142_v40 = vsub.f32 %v72_v24, %v119_v33  ;;  %v154_v42 = vsub.f32 %v72_v24, %v75_v36  ;;  %v141_v43 = vsub.f32 %v71_v22, %v116_v37  ;;  %s267_s4 = scalar_lea.vmem %s184_s30, 512  ;;  %p272_p2 = scmp.lt.s32.totalorder %s184_s30, %s184_s30 }
  0x2d   :  { %v117_v48 = vsel %vm115_vm1, %v110_v28, %v112_v29  ;;  %v173_v49 = vadd.f32 %v160_v32, %v153_v35  ;;  %p268_p1 = scmp.ne.s32.totalorder %s184_s30, %s267_s4  ;;  %p273_p3 = scmp.lt.s32.totalorder %s267_s4, %s267_s4 }
  0x2e   :  { %v164_v41 = vadd.f32 %v160_v32, %v140_v34  ;;  %v165_v54 = vadd.f32 %v161_v44, %v141_v43  ;;  %v143_v55 = vsub.f32 %v73_v25, %v117_v48  ;;  %v166_v57 = vadd.f32 %v162_v47, %v142_v40 }
  0x2f   :  { %v174_v61 = vadd.f32 %v162_v47, %v154_v42  ;;  %p274_p4 = por %p273_p3, %p272_p2 }
  0x31   :  { %p275_p5 = pnand %p274_p4, %p268_p1 }
  0x99   :  { %v86_v4 = vpop.permute.xlu0 %85  ;;  %v89_v5 = vpop.permute.xlu1 %88 }
  0x9a   :  { %v87_v6 = vsel %vm84_vm0, %v86_v4, %v66_v0  ;;  %v90_v7 = vsel %vm84_vm0, %v89_v5, %v339_v1 }
  0x9b   :  { %97 = vrot.lane.b32.xlu0 %v87_v6, %s299_s0 }
  0x9d   :  { %v92_v8 = vpop.permute.xlu0 %91  ;;  %v95_v9 = vpop.permute.xlu1 %94 }
  0x9e   :  { %v93_v10 = vsel %vm84_vm0, %v92_v8, %v342_v2  ;;  %v96_v11 = vsel %vm84_vm0, %v95_v9, %v344_v3 }
  0x9f   :  { %99 = vrot.lane.b32.xlu0 %v90_v7, %s299_s0  ;;  %101 = vrot.lane.b32.xlu1 %v93_v10, %s299_s0 }
  0xa3   :  { %103 = vrot.lane.b32.xlu1 %v96_v11, %s299_s0 }
 0x10d   :  { %v98_v12 = vpop.permute.xlu0 %97 }
 0x10e   :  { %v105_v13 = vsel %vm84_vm0, %v98_v12, %v66_v0 }
 0x10f   :  { %124 = vrot.lane.b32.xlu0 %v105_v13, %s300_s2 }
 0x111   :  { %v102_v14 = vpop.permute.xlu1 %101  ;;  %v100_v15 = vpop.permute.xlu0 %99 }
 0x112   :  { %v107_v16 = vsel %vm84_vm0, %v102_v14, %v342_v2  ;;  %v106_v17 = vsel %vm84_vm0, %v100_v15, %v339_v1 }
 0x113   :  { %128 = vrot.lane.b32.xlu1 %v107_v16, %s300_s2  ;;  %126 = vrot.lane.b32.xlu0 %v106_v17, %s300_s2 }
 0x115   :  { %v104_v18 = vpop.permute.xlu1 %103 }
 0x116   :  { %v108_v19 = vsel %vm84_vm0, %v104_v18, %v344_v3 }
 0x117   :  { %130 = vrot.lane.b32.xlu1 %v108_v19, %s300_s2 }
 0x181   :  { %v125_v38 = vpop.permute.xlu0 %124 }
 0x182   :  { %v136_v39 = vsub.f32 %v66_v0, %v125_v38  ;;  %v167_v0 = vadd.f32 %v163_v56, %v143_v55 }
 0x184   :  { %v144_v45 = vadd.f32 %v140_v34, %v136_v39  ;;  %v155_v46 = vadd.f32 %v153_v35, %v136_v39 }
 0x185   :  { %v129_v50 = vpop.permute.xlu1 %128  ;;  %v127_v51 = vpop.permute.xlu0 %126 }
 0x186   :  { %149 = vst.msk [vmem:[#allocation8] sm:$0xff] %vm148_vm2, %v144_v45  ;;  %v138_v52 = vsub.f32 %v342_v2, %v129_v50  ;;  %v137_v53 = vsub.f32 %v339_v1, %v127_v51 }
 0x187   :  { %158 = vst.msk [vmem:[#allocation8] sm:$0x1] %vm157_vm3, %v155_v46 }
 0x188   :  { %169 = vst.msk [vmem:[#allocation8] sm:$0xff] %vm168_vm4, %v164_v41  ;;  %v146_v58 = vadd.f32 %v142_v40, %v138_v52  ;;  %v156_v59 = vadd.f32 %v154_v42, %v138_v52  ;;  %v145_v60 = vadd.f32 %v141_v43, %v137_v53 }
 0x189   :  { %176 = vst.msk [vmem:[#allocation8] sm:$0x1] %vm175_vm5, %v173_v49  ;;  %v131_v62 = vpop.permute.xlu1 %130 }
 0x18a   :  { %151 = vst.msk [vmem:[#allocation8 + $0x10] sm:$0xff] %vm148_vm2, %v146_v58  ;;  %150 = vst.msk [vmem:[#allocation8 + $0x8] sm:$0xff] %vm148_vm2, %v145_v60  ;;  %v139_v63 = vsub.f32 %v344_v3, %v131_v62 }
 0x18b   :  { %159 = vst.msk [vmem:[#allocation8 + $0x10] sm:$0x1] %vm157_vm3, %v156_v59 }
 0x18c   :  { %170 = vst.msk [vmem:[#allocation8 + $0x8] sm:$0xff] %vm168_vm4, %v165_v54  ;;  %171 = vst.msk [vmem:[#allocation8 + $0x10] sm:$0xff] %vm168_vm4, %v166_v57  ;;  %v147_v1 = vadd.f32 %v143_v55, %v139_v63 }
 0x18d   :  { %177 = vst.msk [vmem:[#allocation8 + $0x10] sm:$0x1] %vm175_vm5, %v174_v61 }
 0x18e   :  { %152 = vst.msk [vmem:[#allocation8 + $0x18] sm:$0xff] %vm148_vm2, %v147_v1 }
 0x18f   :  { %172 = vst.msk [vmem:[#allocation8 + $0x18] sm:$0xff] %vm168_vm4, %v167_v0 }
 0x190   :  { %278 = shalt.err (!%p275_p5)
}
 0x191   :  { %189 = dma.vmem_to_hbm [thread:$0]  %s184_s30, 512, %s396_s3, [#allocation4], %s295_s17, %s295_s17, %s296_s18  }
 0x192   :  { %291 = dma.done.wait [#allocation4], 512  }
 0x193   :  { %292 = vsyncadd [#allocation4], 4294966784 }
 0x194   :  { %193 = vsyncpa [#allocation3], 1 }
 0x195   :  { %194 = vsyncpa [#allocation6], 1 }
 0x196   :  { %195 = vsyncpa [#allocation4], 1 }

</bundles_post_ra>
